<compile_context>
chip_gen: v7x
topology: tpu7x:2x2x1
jax: 0.10.0
libtpu: 0.0.40
codegen_flags: <defaults>
</compile_context>

<pallas_src>
import functools

import jax
import jax.numpy as jnp
from jax import lax
from jax.experimental import pallas as pl
from jax.experimental.pallas import tpu as pltpu


# ----------------------------------------------------------------------------
# Kernel bodies
# ----------------------------------------------------------------------------


def _topk_err_rows(xr, tr, xc, tc, out_ref, *, k):
    """Per-row sums of the k largest squared cosine-sim errors.

    xr/tr: (Bm, D) row blocks (already L2-normalized, matmul dtype).
    xc/tc: (N, D) column operands (already L2-normalized, matmul dtype).
    out_ref: (Bm, 1) f32 per-row top-k sums.  (Narrow output is acceptable: it is
             a tiny per-block masked store, not on the critical path.)
    """
    # Contract on the last axis of both operands: no explicit transpose, the MXU
    # consumes both operands in their natural (rows, D) layout.
    dn = (((1,), (1,)), ((), ()))
    sim_x = lax.dot_general(xr, xc, dimension_numbers=dn,
                            preferred_element_type=jnp.float32)   # (Bm, N)
    sim_t = lax.dot_general(tr, tc, dimension_numbers=dn,
                            preferred_element_type=jnp.float32)   # (Bm, N)
    err = (sim_x - sim_t) ** 2                                    # >= 0; diag ~0

    # Top-k via iterated max with fused knockout: each iteration does one pass
    # over the (Bm, N) buffer (select + max), instead of two reads + one write.
    m0 = jnp.max(err, axis=-1, keepdims=True)                     # (Bm, 1)
    acc0 = jnp.zeros((err.shape[0], 1), jnp.float32)

    def body(_, carry):
        e, m_prev, acc = carry
        # Knock out with 0.0 (err >= 0): ties collapse, but the accumulator can
        # never go to -inf even for all-zero (padded / degenerate) rows.
        masked = jnp.where(e == m_prev, jnp.float32(0.0), e)
        m_next = jnp.max(masked, axis=-1, keepdims=True)
        return masked, m_next, acc + m_prev

    _, m_last, acc = lax.fori_loop(0, k - 1, body, (err, m0, acc0), unroll=True)
    out_ref[...] = acc + m_last


def _similarity_single_kernel(x_ref, t_ref, out_ref, *, k):
    # Whole problem in one VMEM block; rows and columns are the same arrays.
    x = x_ref[...]
    t = t_ref[...]
    _topk_err_rows(x, t, x, t, out_ref, k=k)


def _similarity_tiled_kernel(xc_ref, tc_ref, out_ref, *, k, block_m):
    # Row block is a slice of the resident column operand (no extra input DMA).
    r0 = pl.multiple_of(pl.program_id(0) * block_m, block_m)
    xr = xc_ref[pl.ds(r0, block_m), :]
    tr = tc_ref[pl.ds(r0, block_m), :]
    _topk_err_rows(xr, tr, xc_ref[...], tc_ref[...], out_ref, k=k)


# ----------------------------------------------------------------------------
# Planning helpers
# ----------------------------------------------------------------------------


def _vmem_budget_bytes():
    """(usable budget, capacity) for the current TPU generation."""
    try:
        cap = int(pltpu.get_tpu_info().vmem_capacity_bytes)
    except Exception:
        cap = 64 * 1024 * 1024  # conservative: v7x per-TC VMEM
    return int(cap * 3 // 4), cap  # leave headroom for Mosaic internal scratch


def _choose_block_m(n, d, itemsize, budget):
    """Row-block size; None selects the grid-less single-block path."""
    col_bytes = 2 * n * d * itemsize            # 2 resident operands, Buffered(1)

    def body_bytes(rows):                       # ~4 live (rows, N) f32 temporaries
        return 4 * rows * n * 4

    if n <= 512 and col_bytes + body_bytes(n) <= budget:
        return None                             # small problem: no grid overhead
    avail = budget - col_bytes
    if avail <= 0:
        # Resident columns alone exceed this generation's VMEM budget; see the
        # column-streaming TODO at the top of the file.
        return None
    # NOTE: production shapes should keep N and D as multiples of 128 (lane dim);
    # small D (like the demo) underfills the MXU contraction dimension.
    for bm in (1024, 512, 256, 128, 64, 32, 16, 8):
        if body_bytes(bm) <= avail and bm < n:
            return bm
    return None


def _round_up(x, m):
    return ((x + m - 1) // m) * m


def _l2_normalize(v):
    """Row L2-normalization in f32 (eps matches cosine_similarity's 1e-8)."""
    vf = v.astype(jnp.float32)
    ss = jnp.sum(vf * vf, axis=-1, keepdims=True)
    inv = lax.rsqrt(jnp.maximum(ss, jnp.float32(1e-16)))  # == 1 / max(||v||, 1e-8)
    return vf * inv


# ----------------------------------------------------------------------------
# Public entry point
# ----------------------------------------------------------------------------


def similarity_loss(model_output, targets, *, weight=1.0, k=10,
                    block_m=None, matmul_dtype=None):
    """Pallas implementation of the Similarity module's forward pass.

    matmul_dtype: dtype fed to the MXU.  Default keeps the input dtype (exact for
    f32); pass jnp.bfloat16 on v6e/v7x for several-x matmul throughput at a small
    accuracy cost (normalization and all top-k arithmetic remain f32).
    """
    assert model_output.shape == targets.shape
    n, d = model_output.shape
    assert 1 <= k <= n, "topk requires k <= number of rows"

    # Normalize ONCE in the wrapper so the kernel never re-normalizes the
    # resident column operands per grid step.
    if matmul_dtype is None:
        matmul_dtype = model_output.dtype
    xn = _l2_normalize(model_output).astype(matmul_dtype)
    tn = _l2_normalize(targets).astype(matmul_dtype)
    itemsize = jnp.dtype(matmul_dtype).itemsize

    budget, cap = _vmem_budget_bytes()
    vmem_limit = min(budget, cap)

    if block_m is None:
        block_m = _choose_block_m(n, d, itemsize, budget)

    if block_m is None or block_m >= n:
        # Single block, no grid: avoids per-step pipeline overhead entirely.
        row_sums = pl.pallas_call(
            functools.partial(_similarity_single_kernel, k=k),
            out_shape=jax.ShapeDtypeStruct((n, 1), jnp.float32),
            compiler_params=pltpu.CompilerParams(vmem_limit_bytes=vmem_limit),
        )(xn, tn)
    else:
        # Pad N up to a block_m multiple: padded rows normalize to zero, give
        # all-zero err rows/columns, and contribute exactly 0 to the loss.
        n_pad = _round_up(n, block_m)
        if n_pad != n:
            pad = ((0, n_pad - n), (0, 0))
            xn = jnp.pad(xn, pad)
            tn = jnp.pad(tn, pad)
        nb = n_pad // block_m

        row_sums = pl.pallas_call(
            functools.partial(_similarity_tiled_kernel, k=k, block_m=block_m),
            out_shape=jax.ShapeDtypeStruct((n_pad, 1), jnp.float32),
            grid=(nb,),
            in_specs=[
                # Resident column operands: constant index_map, single buffer.
                pl.BlockSpec((n_pad, d), lambda i: (0, 0),
                             pipeline_mode=pl.Buffered(1)),
                pl.BlockSpec((n_pad, d), lambda i: (0, 0),
                             pipeline_mode=pl.Buffered(1)),
            ],
            out_specs=pl.BlockSpec((block_m, 1), lambda i: (i, 0)),
            compiler_params=pltpu.CompilerParams(
                dimension_semantics=("parallel",),   # megacore split on v7x
                vmem_limit_bytes=vmem_limit,
            ),
        )(xn, tn)

    total = jnp.sum(row_sums)
    return jnp.float32(weight) * total / jnp.float32(n * k)


# ----------------------------------------------------------------------------
# Pure-JAX reference + self-check
# ----------------------------------------------------------------------------


def _reference_loss(model_output, targets, *, weight=1.0, k=10):
    """Pure-JAX reference mirroring the PyTorch module, for verification."""
    eps = 1e-8

    def cos_sim(a):
        an = jnp.maximum(jnp.linalg.norm(a, axis=-1, keepdims=True), eps)
        return (a @ a.T) / (an * an.T)

    n = model_output.shape[0]
    sx = cos_sim(model_output.astype(jnp.float32))
    st = cos_sim(targets.astype(jnp.float32))
    eye = jnp.eye(n, dtype=bool)
    sx = jnp.where(eye, 0.0, sx)
    st = jnp.where(eye, 0.0, st)
    err = (sx - st) ** 2
    worst, _ = lax.top_k(err, k)
    return weight * jnp.mean(worst)


if __name__ == "__main__":
    # Module params (from __init__ defaults): weight=1.0, k=10.
    weight, k = 1.0, 10

    key = jax.random.PRNGKey(0)
    k1, k2, k3, k4 = jax.random.split(key, 4)

    # Small shapes consistent with forward: N rows (N >= k), D features.
    N, D = 16, 32
    model_output = jax.random.normal(k1, (N, D), dtype=jnp.float32)
    targets = jax.random.normal(k2, (N, D), dtype=jnp.float32)

    loss = similarity_loss(model_output, targets, weight=weight, k=k)
    loss = jax.block_until_ready(loss)
    ref = _reference_loss(model_output, targets, weight=weight, k=k)
    assert jnp.allclose(loss, ref, atol=1e-5, rtol=1e-4), (loss, ref)

    # Tiled (gridded, row-parallel) path, f32 matmul: exact tolerance.
    N2, D2 = 128, 64
    mo2 = jax.random.normal(k3, (N2, D2), dtype=jnp.float32)
    tg2 = jax.random.normal(k4, (N2, D2), dtype=jnp.float32)
    loss2 = similarity_loss(mo2, tg2, weight=weight, k=k, block_m=32)
    loss2 = jax.block_until_ready(loss2)
    ref2 = _reference_loss(mo2, tg2, weight=weight, k=k)
    assert jnp.allclose(loss2, ref2, atol=1e-5, rtol=1e-4), (loss2, ref2)

    # Tiled path with bf16 matmul inputs (v6e/v7x fast path): loose tolerance.
    loss3 = similarity_loss(mo2, tg2, weight=weight, k=k, block_m=32,
                            matmul_dtype=jnp.bfloat16)
    loss3 = jax.block_until_ready(loss3)
    assert jnp.allclose(loss3, ref2, atol=1e-2, rtol=5e-2), (loss3, ref2)

    print("KERNEL_OK")
</pallas_src>

<mosaic_0001>
module attributes {stable_mosaic.version = 11 : i64} {
  func.func @_similarity_single_kernel(%arg0: memref<16x32xf32, #tpu.memory_space<vmem>>, %arg1: memref<16x32xf32, #tpu.memory_space<vmem>>, %arg2: memref<16x1xf32, #tpu.memory_space<vmem>>) attributes {dimension_semantics = [], scalar_prefetch = 0 : i64, scratch_operands = 0 : i64, tpu.core_type = #tpu.core_type<tc>} {
    %c0 = arith.constant 0 : index
    %c0_0 = arith.constant 0 : index
    %0 = vector.load %arg0[%c0, %c0_0] : memref<16x32xf32, #tpu.memory_space<vmem>>, vector<16x32xf32>
    %c0_1 = arith.constant 0 : index
    %c0_2 = arith.constant 0 : index
    %1 = vector.load %arg1[%c0_1, %c0_2] : memref<16x32xf32, #tpu.memory_space<vmem>>, vector<16x32xf32>
    %cst = arith.constant dense<0.000000e+00> : vector<16x16xf32>
    %2 = tpu.matmul %0, %0, %cst {dimension_numbers = #tpu.dot_dimension_numbers<[1], [1], [0], [0], [0, 0, 1, 0], [], []>} : vector<16x32xf32>, vector<16x32xf32>, vector<16x16xf32> -> vector<16x16xf32>
    %cst_3 = arith.constant dense<0.000000e+00> : vector<16x16xf32>
    %3 = tpu.matmul %1, %1, %cst_3 {dimension_numbers = #tpu.dot_dimension_numbers<[1], [1], [0], [0], [0, 0, 1, 0], [], []>} : vector<16x32xf32>, vector<16x32xf32>, vector<16x16xf32> -> vector<16x16xf32>
    %4 = arith.subf %2, %3 : vector<16x16xf32>
    %5 = arith.mulf %4, %4 : vector<16x16xf32>
    %cst_4 = arith.constant dense<0xFF800000> : vector<16xf32>
    %6 = vector.multi_reduction <maximumf>, %5, %cst_4 [1] : vector<16x16xf32> to vector<16xf32>
    %7 = vector.shape_cast %6 : vector<16xf32> to vector<16x1xf32>
    %cst_5 = arith.constant 0.000000e+00 : f32
    %8 = vector.broadcast %cst_5 : f32 to vector<16x1xf32>
    %c0_i32 = arith.constant 0 : i32
    %9 = vector.broadcast %7 : vector<16x1xf32> to vector<16x16xf32>
    %10 = arith.cmpf oeq, %5, %9 : vector<16x16xf32>
    %cst_6 = arith.constant 0.000000e+00 : f32
    %11 = vector.broadcast %cst_6 : f32 to vector<16x16xf32>
    %12 = arith.select %10, %11, %5 : vector<16x16xi1>, vector<16x16xf32>
    %cst_7 = arith.constant dense<0xFF800000> : vector<16xf32>
    %13 = vector.multi_reduction <maximumf>, %12, %cst_7 [1] : vector<16x16xf32> to vector<16xf32>
    %14 = vector.shape_cast %13 : vector<16xf32> to vector<16x1xf32>
    %15 = arith.addf %8, %7 : vector<16x1xf32>
    %c1_i32 = arith.constant 1 : i32
    %16 = vector.broadcast %14 : vector<16x1xf32> to vector<16x16xf32>
    %17 = arith.cmpf oeq, %12, %16 : vector<16x16xf32>
    %cst_8 = arith.constant 0.000000e+00 : f32
    %18 = vector.broadcast %cst_8 : f32 to vector<16x16xf32>
    %19 = arith.select %17, %18, %12 : vector<16x16xi1>, vector<16x16xf32>
    %cst_9 = arith.constant dense<0xFF800000> : vector<16xf32>
    %20 = vector.multi_reduction <maximumf>, %19, %cst_9 [1] : vector<16x16xf32> to vector<16xf32>
    %21 = vector.shape_cast %20 : vector<16xf32> to vector<16x1xf32>
    %22 = arith.addf %15, %14 : vector<16x1xf32>
    %c2_i32 = arith.constant 2 : i32
    %23 = vector.broadcast %21 : vector<16x1xf32> to vector<16x16xf32>
    %24 = arith.cmpf oeq, %19, %23 : vector<16x16xf32>
    %cst_10 = arith.constant 0.000000e+00 : f32
    %25 = vector.broadcast %cst_10 : f32 to vector<16x16xf32>
    %26 = arith.select %24, %25, %19 : vector<16x16xi1>, vector<16x16xf32>
    %cst_11 = arith.constant dense<0xFF800000> : vector<16xf32>
    %27 = vector.multi_reduction <maximumf>, %26, %cst_11 [1] : vector<16x16xf32> to vector<16xf32>
    %28 = vector.shape_cast %27 : vector<16xf32> to vector<16x1xf32>
    %29 = arith.addf %22, %21 : vector<16x1xf32>
    %c3_i32 = arith.constant 3 : i32
    %30 = vector.broadcast %28 : vector<16x1xf32> to vector<16x16xf32>
    %31 = arith.cmpf oeq, %26, %30 : vector<16x16xf32>
    %cst_12 = arith.constant 0.000000e+00 : f32
    %32 = vector.broadcast %cst_12 : f32 to vector<16x16xf32>
    %33 = arith.select %31, %32, %26 : vector<16x16xi1>, vector<16x16xf32>
    %cst_13 = arith.constant dense<0xFF800000> : vector<16xf32>
    %34 = vector.multi_reduction <maximumf>, %33, %cst_13 [1] : vector<16x16xf32> to vector<16xf32>
    %35 = vector.shape_cast %34 : vector<16xf32> to vector<16x1xf32>
    %36 = arith.addf %29, %28 : vector<16x1xf32>
    %c4_i32 = arith.constant 4 : i32
    %37 = vector.broadcast %35 : vector<16x1xf32> to vector<16x16xf32>
    %38 = arith.cmpf oeq, %33, %37 : vector<16x16xf32>
    %cst_14 = arith.constant 0.000000e+00 : f32
    %39 = vector.broadcast %cst_14 : f32 to vector<16x16xf32>
    %40 = arith.select %38, %39, %33 : vector<16x16xi1>, vector<16x16xf32>
    %cst_15 = arith.constant dense<0xFF800000> : vector<16xf32>
    %41 = vector.multi_reduction <maximumf>, %40, %cst_15 [1] : vector<16x16xf32> to vector<16xf32>
    %42 = vector.shape_cast %41 : vector<16xf32> to vector<16x1xf32>
    %43 = arith.addf %36, %35 : vector<16x1xf32>
    %c5_i32 = arith.constant 5 : i32
    %44 = vector.broadcast %42 : vector<16x1xf32> to vector<16x16xf32>
    %45 = arith.cmpf oeq, %40, %44 : vector<16x16xf32>
    %cst_16 = arith.constant 0.000000e+00 : f32
    %46 = vector.broadcast %cst_16 : f32 to vector<16x16xf32>
    %47 = arith.select %45, %46, %40 : vector<16x16xi1>, vector<16x16xf32>
    %cst_17 = arith.constant dense<0xFF800000> : vector<16xf32>
    %48 = vector.multi_reduction <maximumf>, %47, %cst_17 [1] : vector<16x16xf32> to vector<16xf32>
    %49 = vector.shape_cast %48 : vector<16xf32> to vector<16x1xf32>
    %50 = arith.addf %43, %42 : vector<16x1xf32>
    %c6_i32 = arith.constant 6 : i32
    %51 = vector.broadcast %49 : vector<16x1xf32> to vector<16x16xf32>
    %52 = arith.cmpf oeq, %47, %51 : vector<16x16xf32>
    %cst_18 = arith.constant 0.000000e+00 : f32
    %53 = vector.broadcast %cst_18 : f32 to vector<16x16xf32>
    %54 = arith.select %52, %53, %47 : vector<16x16xi1>, vector<16x16xf32>
    %cst_19 = arith.constant dense<0xFF800000> : vector<16xf32>
    %55 = vector.multi_reduction <maximumf>, %54, %cst_19 [1] : vector<16x16xf32> to vector<16xf32>
    %56 = vector.shape_cast %55 : vector<16xf32> to vector<16x1xf32>
    %57 = arith.addf %50, %49 : vector<16x1xf32>
    %c7_i32 = arith.constant 7 : i32
    %58 = vector.broadcast %56 : vector<16x1xf32> to vector<16x16xf32>
    %59 = arith.cmpf oeq, %54, %58 : vector<16x16xf32>
    %cst_20 = arith.constant 0.000000e+00 : f32
    %60 = vector.broadcast %cst_20 : f32 to vector<16x16xf32>
    %61 = arith.select %59, %60, %54 : vector<16x16xi1>, vector<16x16xf32>
    %cst_21 = arith.constant dense<0xFF800000> : vector<16xf32>
    %62 = vector.multi_reduction <maximumf>, %61, %cst_21 [1] : vector<16x16xf32> to vector<16xf32>
    %63 = vector.shape_cast %62 : vector<16xf32> to vector<16x1xf32>
    %64 = arith.addf %57, %56 : vector<16x1xf32>
    %c8_i32 = arith.constant 8 : i32
    %65 = vector.broadcast %63 : vector<16x1xf32> to vector<16x16xf32>
    %66 = arith.cmpf oeq, %61, %65 : vector<16x16xf32>
    %cst_22 = arith.constant 0.000000e+00 : f32
    %67 = vector.broadcast %cst_22 : f32 to vector<16x16xf32>
    %68 = arith.select %66, %67, %61 : vector<16x16xi1>, vector<16x16xf32>
    %cst_23 = arith.constant dense<0xFF800000> : vector<16xf32>
    %69 = vector.multi_reduction <maximumf>, %68, %cst_23 [1] : vector<16x16xf32> to vector<16xf32>
    %70 = vector.shape_cast %69 : vector<16xf32> to vector<16x1xf32>
    %71 = arith.addf %64, %63 : vector<16x1xf32>
    %72 = arith.addf %71, %70 : vector<16x1xf32>
    %c0_24 = arith.constant 0 : index
    %c0_25 = arith.constant 0 : index
    %73 = vector.load %arg2[%c0_24, %c0_25] : memref<16x1xf32, #tpu.memory_space<vmem>>, vector<16x1xf32>
    tpu.vector_store %arg2[%c0_24, %c0_25], %72 {strides = array<i32>} : memref<16x1xf32, #tpu.memory_space<vmem>>, vector<16x1xf32>,
    return
  }
}

</mosaic_0001>

<bundles_post_ra>
// kernel: tpu_custom_call.1
= control target key start
LH: loop header
LB: loop body
LE: loop exit
PB: predicated region body
PF: predicated region fallthrough
CT: control target
= control target key end

     0   :  { %7 = vsyncpa [#allocation3], 0  ;;  %s527_s0 = inlined_call_operand.hbm [shape: f32[16,32], index: 0, kind: input, shape index: {}]   ;;  %s528_s1 = inlined_call_operand.hbm [shape: f32[16,32], index: 1, kind: input, shape index: {}]   ;;  %s529_s2 = inlined_call_operand.vmem [shape: f32[16,1], index: 2, kind: output, shape index: {}]  }
   0x1   :  { %8 = vsyncpa [#allocation5], 0  ;;  %s430_s9 = smov [#allocation2]   ;;  %s382_s13 = scalar_lea.hbm %s527_s0, 256 }
   0x2   :  { %s14_s10 = sshll.u32 %s430_s9, 4  ;;  %p383_p0 = scmp.ne.s32.totalorder %s527_s0, %s382_s13  ;;  %s15_s10 = int_to_ptr.vmem [resolvable:$true] %s14_s10 }
   0x3   :  { %p386_p1 = scmp.lt.u32.totalorder %s382_s13, %s527_s0 }
   0x5   :  { %p388_p2 = pnand %p386_p1, %p383_p0 }
   0x7   :  { %391 = shalt.err (!%p388_p2)
}
   0x8   :  { %s392_s18 = scalar_lea.vmem %s15_s10, 256  ;;  %p397_p4 = scmp.lt.s32.totalorder %s15_s10, %s15_s10 }
   0x9   :  { %p393_p3 = scmp.ne.s32.totalorder %s15_s10, %s392_s18  ;;  %p398_p5 = scmp.lt.s32.totalorder %s392_s18, %s392_s18 }
   0xb   :  { %p399_p6 = por %p398_p5, %p397_p4 }
   0xd   :  { %p400_p7 = pnand %p399_p6, %p393_p3 }
   0xf   :  { %403 = shalt.err (!%p400_p7)
}
  0x10   :  { %s431_s19 = smov 128   ;;  %s432_s20 = smov 8  }
  0x11   :  { %20 = dma.hbm_to_vmem [thread:$0]  %s527_s0, 256, %s15_s10, [#allocation3], %s431_s19, %s431_s19, %s432_s20  }
  0x12   :  { %s433_s23 = smov [#allocation4]   ;;  %s404_s27 = scalar_lea.hbm %s528_s1, 256 }
  0x13   :  { %s26_s24 = sshll.u32 %s433_s23, 4  ;;  %p405_p8 = scmp.ne.s32.totalorder %s528_s1, %s404_s27  ;;  %s27_s24 = int_to_ptr.vmem [resolvable:$true] %s26_s24 }
  0x14   :  { %p408_p9 = scmp.lt.u32.totalorder %s404_s27, %s528_s1 }
  0x16   :  { %p410_p10 = pnand %p408_p9, %p405_p8 }
  0x18   :  { %413 = shalt.err (!%p410_p10)
}
  0x19   :  { %s414_s4 = scalar_lea.vmem %s27_s24, 256  ;;  %p419_p12 = scmp.lt.s32.totalorder %s27_s24, %s27_s24 }
  0x1a   :  { %p415_p11 = scmp.ne.s32.totalorder %s27_s24, %s414_s4  ;;  %p420_p13 = scmp.lt.s32.totalorder %s414_s4, %s414_s4 }
  0x1c   :  { %p421_p0 = por %p420_p13, %p419_p12 }
  0x1e   :  { %p422_p1 = pnand %p421_p0, %p415_p11 }
  0x20   :  { %425 = shalt.err (!%p422_p1)
}
  0x21   :  { %32 = dma.hbm_to_vmem [thread:$0]  %s528_s1, 256, %s27_s24, [#allocation5], %s431_s19, %s431_s19, %s432_s20  }
  0x22   :  { %426 = dma.done.wait [#allocation3], 256  }
  0x23   :  { %427 = vsyncadd [#allocation3], 4294967040 }
  0x24   :  { %428 = dma.done.wait [#allocation5], 256  }
  0x25   :  { %429 = vsyncadd [#allocation5], 4294967040  ;;  %vm43_vm0 = vcmask 261120   ;;  %v39_v0 = vld [vmem:[#allocation2] sm:$0xff]  ;;  %v40_v1 = vld [vmem:[#allocation2 + $0x8] sm:$0xff]  ;;  %vm210_vm2 = vcmask 130048  }
  0x26   :  { %vm367_vm1 = vmpackc.low %vm43_vm0, %vm43_vm0  ;;  %v41_v2 = vld [vmem:[#allocation4] sm:$0xff]  ;;  %v366_v3 = vpack.c.bf16 %v40_v1, %v39_v0  ;;  %v42_v4 = vld [vmem:[#allocation4 + $0x8] sm:$0xff]  ;;  %356 = vmatprep.mubr.msk.f32.mxu0 %vm43_vm0, %v39_v0 }
  0x27   :  { %363 = vmatprep.mubr.msk.f32.mxu1 %vm43_vm0, %v41_v2  ;;  %v372_v5 = vpack.c.bf16 %v42_v4, %v41_v2 }
  0x28   :  { %368 = vmatprep.subr.msk.bf16.mxu0 %vm367_vm1, %v366_v3 }
  0x29   :  { %374 = vmatprep.subr.msk.bf16.mxu1 %vm367_vm1, %v372_v5  ;;  %371 = vmatpush3.bf16.xpose.msk.msra.mxu0 %vm367_vm1, %v366_v3 }
  0x2a   :  { %377 = vmatpush3.bf16.xpose.msk.msra.mxu1 %vm367_vm1, %v372_v5 }
  0x30   :  { %357 = vmatmul.mubr.msk.f32.vlgmr.msra.gmra.mrb[0].mxu0 %vm43_vm0, %v40_v1 }
  0x31   :  { %364 = vmatmul.mubr.msk.f32.vlgmr.msra.gmra.mrb[0].mxu1 %vm43_vm0, %v42_v4 }
 0x103   :  { %v358_v6 = vpop.f32.mrb[0].mxu0 }
 0x104   :  { %v365_v7 = vpop.f32.mrb[0].mxu1  ;;  %v116_v8 = vpop.f32.mrb[1].mxu0 }
 0x105   :  { %v207_v9 = vsub.f32 %v358_v6, %v365_v7  ;;  %v197_v10 = vpop.f32.mrb[1].mxu1 }
 0x106   :  { %v206_v11 = vsub.f32 %v116_v8, %v197_v10 }
 0x107   :  { %v209_v13 = vmul.f32 %v207_v9, %v207_v9 }
 0x108   :  { %v208_v12 = vmul.f32 %v206_v11, %v206_v11 }
 0x109   :  { %v214_v15 = vsel %vm210_vm2, %v209_v13, -inf }
 0x10a   :  { %v211_v14 = vsel %vm210_vm2, %v208_v12, -inf }
 0x10b   :  { %212 = vmax.xlane.f32.xlu0 %v211_v14 }
 0x10f   :  { %215 = vmax.xlane.f32.xlu0 %v214_v15 }
 0x198   :  { %v475_v16 = vpop.xlane.xlu0 %212 }
 0x199   :  { %vm217_vm3 = vcmp.eq.f32.partialorder %v208_v12, %v475_v16 }
 0x19a   :  { %v219_v17 = vsel %vm217_vm3, 0.0, %v208_v12 }
 0x19b   :  { %v221_v18 = vsel %vm210_vm2, %v219_v17, -inf }
 0x19c   :  { %222 = vmax.xlane.f32.xlu1 %v221_v18  ;;  %v479_v19 = vpop.xlane.xlu0 %215 }
 0x19d   :  { %vm218_vm4 = vcmp.eq.f32.partialorder %v209_v13, %v479_v19 }
 0x19e   :  { %v220_v20 = vsel %vm218_vm4, 0.0, %v209_v13 }
 0x19f   :  { %v224_v21 = vsel %vm210_vm2, %v220_v20, -inf }
 0x1a0   :  { %225 = vmax.xlane.f32.xlu1 %v224_v21 }
 0x229   :  { %v483_v22 = vpop.xlane.xlu1 %222 }
 0x22a   :  { %vm229_vm5 = vcmp.eq.f32.partialorder %v219_v17, %v483_v22  ;;  %v239_v6 = vadd.f32 %v483_v22, %v475_v16 }
 0x22b   :  { %v231_v23 = vsel %vm229_vm5, 0.0, %v219_v17 }
 0x22c   :  { %v233_v24 = vsel %vm210_vm2, %v231_v23, -inf }
 0x22d   :  { %234 = vmax.xlane.f32.xlu0 %v233_v24  ;;  %v487_v25 = vpop.xlane.xlu1 %225 }
 0x22e   :  { %vm230_vm6 = vcmp.eq.f32.partialorder %v220_v20, %v487_v25  ;;  %v240_v8 = vadd.f32 %v487_v25, %v479_v19 }
 0x22f   :  { %v232_v26 = vsel %vm230_vm6, 0.0, %v220_v20 }
 0x230   :  { %v236_v27 = vsel %vm210_vm2, %v232_v26, -inf }
 0x231   :  { %237 = vmax.xlane.f32.xlu1 %v236_v27 }
 0x2ba   :  { %v491_v28 = vpop.xlane.xlu0 %234 }
 0x2bb   :  { %vm241_vm7 = vcmp.eq.f32.partialorder %v231_v23, %v491_v28  ;;  %v251_v7 = vadd.f32 %v239_v6, %v491_v28 }
 0x2bc   :  { %v243_v29 = vsel %vm241_vm7, 0.0, %v231_v23 }
 0x2bd   :  { %v245_v30 = vsel %vm210_vm2, %v243_v29, -inf }
 0x2be   :  { %v495_v31 = vpop.xlane.xlu1 %237  ;;  %246 = vmax.xlane.f32.xlu0 %v245_v30 }
 0x2bf   :  { %vm242_vm8 = vcmp.eq.f32.partialorder %v232_v26, %v495_v31  ;;  %v252_v10 = vadd.f32 %v240_v8, %v495_v31 }
 0x2c0   :  { %v244_v32 = vsel %vm242_vm8, 0.0, %v232_v26 }
 0x2c1   :  { %v248_v33 = vsel %vm210_vm2, %v244_v32, -inf }
 0x2c2   :  { %249 = vmax.xlane.f32.xlu1 %v248_v33 }
 0x34b   :  { %v499_v34 = vpop.xlane.xlu0 %246 }
 0x34c   :  { %vm253_vm9 = vcmp.eq.f32.partialorder %v243_v29, %v499_v34  ;;  %v263_v9 = vadd.f32 %v251_v7, %v499_v34 }
 0x34d   :  { %v255_v35 = vsel %vm253_vm9, 0.0, %v243_v29 }
 0x34e   :  { %v257_v36 = vsel %vm210_vm2, %v255_v35, -inf }
 0x34f   :  { %v250_v37 = vpop.xlane.xlu1 %249  ;;  %258 = vmax.xlane.f32.xlu0 %v257_v36 }
 0x350   :  { %vm254_vm10 = vcmp.eq.f32.partialorder %v244_v32, %v250_v37  ;;  %v264_v12 = vadd.f32 %v252_v10, %v250_v37 }
 0x351   :  { %v256_v38 = vsel %vm254_vm10, 0.0, %v244_v32 }
 0x352   :  { %v260_v39 = vsel %vm210_vm2, %v256_v38, -inf }
 0x353   :  { %261 = vmax.xlane.f32.xlu1 %v260_v39 }
 0x3dc   :  { %v259_v40 = vpop.xlane.xlu0 %258 }
 0x3dd   :  { %vm265_vm11 = vcmp.eq.f32.partialorder %v255_v35, %v259_v40  ;;  %v275_v11 = vadd.f32 %v263_v9, %v259_v40 }
 0x3de   :  { %v267_v41 = vsel %vm265_vm11, 0.0, %v255_v35 }
 0x3df   :  { %v269_v42 = vsel %vm210_vm2, %v267_v41, -inf }
 0x3e0   :  { %v262_v43 = vpop.xlane.xlu1 %261  ;;  %270 = vmax.xlane.f32.xlu0 %v269_v42 }
 0x3e1   :  { %vm266_vm12 = vcmp.eq.f32.partialorder %v256_v38, %v262_v43  ;;  %v276_v14 = vadd.f32 %v264_v12, %v262_v43 }
 0x3e2   :  { %v268_v44 = vsel %vm266_vm12, 0.0, %v256_v38 }
 0x3e3   :  { %v272_v45 = vsel %vm210_vm2, %v268_v44, -inf }
 0x3e4   :  { %273 = vmax.xlane.f32.xlu1 %v272_v45 }
 0x46d   :  { %v271_v46 = vpop.xlane.xlu0 %270 }
 0x46e   :  { %vm277_vm13 = vcmp.eq.f32.partialorder %v267_v41, %v271_v46  ;;  %v287_v13 = vadd.f32 %v275_v11, %v271_v46 }
 0x46f   :  { %v279_v47 = vsel %vm277_vm13, 0.0, %v267_v41 }
 0x470   :  { %v281_v48 = vsel %vm210_vm2, %v279_v47, -inf }
 0x471   :  { %v274_v49 = vpop.xlane.xlu1 %273  ;;  %282 = vmax.xlane.f32.xlu0 %v281_v48 }
 0x472   :  { %vm278_vm14 = vcmp.eq.f32.partialorder %v268_v44, %v274_v49  ;;  %v288_v17 = vadd.f32 %v276_v14, %v274_v49 }
 0x473   :  { %v280_v50 = vsel %vm278_vm14, 0.0, %v268_v44 }
 0x474   :  { %v284_v51 = vsel %vm210_vm2, %v280_v50, -inf }
 0x475   :  { %285 = vmax.xlane.f32.xlu1 %v284_v51 }
 0x4fe   :  { %v283_v52 = vpop.xlane.xlu0 %282 }
 0x4ff   :  { %vm289_vm15 = vcmp.eq.f32.partialorder %v279_v47, %v283_v52  ;;  %v299_v15 = vadd.f32 %v287_v13, %v283_v52 }
 0x500   :  { %v291_v53 = vsel %vm289_vm15, 0.0, %v279_v47 }
 0x501   :  { %v293_v54 = vsel %vm210_vm2, %v291_v53, -inf }
 0x502   :  { %v286_v55 = vpop.xlane.xlu1 %285  ;;  %294 = vmax.xlane.f32.xlu0 %v293_v54 }
 0x503   :  { %vm290_vm0 = vcmp.eq.f32.partialorder %v280_v50, %v286_v55  ;;  %v300_v20 = vadd.f32 %v288_v17, %v286_v55 }
 0x504   :  { %v292_v56 = vsel %vm290_vm0, 0.0, %v280_v50 }
 0x505   :  { %v296_v57 = vsel %vm210_vm2, %v292_v56, -inf }
 0x506   :  { %297 = vmax.xlane.f32.xlu1 %v296_v57 }
 0x58f   :  { %v295_v58 = vpop.xlane.xlu0 %294 }
 0x590   :  { %vm301_vm1 = vcmp.eq.f32.partialorder %v291_v53, %v295_v58  ;;  %v311_v18 = vadd.f32 %v299_v15, %v295_v58 }
 0x591   :  { %v303_v59 = vsel %vm301_vm1, 0.0, %v291_v53 }
 0x592   :  { %v305_v60 = vsel %vm210_vm2, %v303_v59, -inf }
 0x593   :  { %v298_v61 = vpop.xlane.xlu1 %297  ;;  %306 = vmax.xlane.f32.xlu0 %v305_v60 }
 0x594   :  { %vm302_vm3 = vcmp.eq.f32.partialorder %v292_v56, %v298_v61  ;;  %v312_v22 = vadd.f32 %v300_v20, %v298_v61 }
 0x595   :  { %v304_v62 = vsel %vm302_vm3, 0.0, %v292_v56 }
 0x596   :  { %v308_v63 = vsel %vm210_vm2, %v304_v62, -inf }
 0x597   :  { %309 = vmax.xlane.f32.xlu1 %v308_v63 }
 0x620   :  { %v307_v0 = vpop.xlane.xlu0 %306 }
 0x621   :  { %vm313_vm4 = vcmp.eq.f32.partialorder %v303_v59, %v307_v0  ;;  %v323_v21 = vadd.f32 %v311_v18, %v307_v0 }
 0x622   :  { %v315_v1 = vsel %vm313_vm4, 0.0, %v303_v59 }
 0x623   :  { %v317_v2 = vsel %vm210_vm2, %v315_v1, -inf }
 0x624   :  { %v310_v3 = vpop.xlane.xlu1 %309  ;;  %318 = vmax.xlane.f32.xlu0 %v317_v2 }
 0x625   :  { %vm314_vm5 = vcmp.eq.f32.partialorder %v304_v62, %v310_v3  ;;  %v324_v24 = vadd.f32 %v312_v22, %v310_v3 }
 0x626   :  { %v316_v4 = vsel %vm314_vm5, 0.0, %v304_v62 }
 0x627   :  { %v320_v5 = vsel %vm210_vm2, %v316_v4, -inf  ;;  %vm327_vm2 = vcmask 7168  }
 0x628   :  { %321 = vmax.xlane.f32.xlu1 %v320_v5 }
 0x6b1   :  { %v319_v16 = vpop.xlane.xlu0 %318 }
 0x6b2   :  { %v325_v23 = vadd.f32 %v323_v21, %v319_v16 }
 0x6b4   :  { %328 = vst.msk [vmem:[%s529_s2] sm:$0xff] %vm327_vm2, %v325_v23 }
 0x6b5   :  { %v322_v19 = vpop.xlane.xlu1 %321 }
 0x6b6   :  { %v326_v25 = vadd.f32 %v324_v24, %v322_v19 }
 0x6b8   :  { %329 = vst.msk [vmem:[%s529_s2 + $0x8] sm:$0xff] %vm327_vm2, %v326_v25 }
 0x6b9   :  { %334 = vsyncpa [#allocation3], 1 }
 0x6ba   :  { %335 = vsyncpa [#allocation5], 1 }

</bundles_post_ra>
